<compile_context>
chip_gen: v7x
topology: tpu7x:2x2x1
jax: 0.10.0
libtpu: 0.0.40
codegen_flags: <defaults>
</compile_context>

<pallas_src>
import functools

import jax
import jax.numpy as jnp
from jax.experimental import pallas as pl
from jax.experimental.pallas import tpu as pltpu


def _label_smoothing_kernel(ids_ref, out_ref, *, smoothing_value, pad_id,
                            trg_vocab_size):
    # ids_ref: (tile_b, 1) int32 block for the current batch tile (resident
    #          across the vocab grid axis since its block index ignores j).
    # out_ref: (tile_b, tile_v) block for vocab tile j = pl.program_id(1).
    tb, tv = out_ref.shape
    v_start = pl.program_id(1) * tv

    ids = ids_ref[...]                                        # (tb, 1) int32
    col = jax.lax.broadcasted_iota(jnp.int32, (tb, tv), 1) + v_start

    confidence = jnp.float32(1.0 - smoothing_value)
    base = jnp.float32(smoothing_value / (trg_vocab_size - 2))

    # scatter_(1, ids, confidence) folded together with the base fill.
    vals = jnp.where(col == ids, confidence, base)
    # out[:, pad_id] = 0  and  masked_fill_(ids == pad_id, 0) in one select.
    zero_mask = (col == pad_id) | (ids == pad_id)
    vals = jnp.where(zero_mask, jnp.float32(0.0), vals)

    out_ref[...] = vals.astype(out_ref.dtype)


def label_smoothing_distribution(trg_token_ids_batch, *, smoothing_value,
                                 pad_id, trg_vocab_size,
                                 tile_b=256, tile_v=2048,
                                 out_dtype=jnp.float32):
    assert 0.0 <= smoothing_value <= 1.0
    batch_size = trg_token_ids_batch.shape[0]
    ids = trg_token_ids_batch.astype(jnp.int32).reshape(batch_size, 1)

    # Clamp tiles to the array and keep block dims either a multiple of the
    # (8, 128) native tile or equal to the full array dim.
    if batch_size <= tile_b:
        tile_b = batch_size
    else:
        tile_b = max((tile_b // 8) * 8, 8)
    if trg_vocab_size <= tile_v:
        tile_v = trg_vocab_size
    else:
        tile_v = max((tile_v // 128) * 128, 128)

    grid = (pl.cdiv(batch_size, tile_b), pl.cdiv(trg_vocab_size, tile_v))

    kernel = functools.partial(
        _label_smoothing_kernel,
        smoothing_value=float(smoothing_value),
        pad_id=int(pad_id),
        trg_vocab_size=int(trg_vocab_size),
    )

    return pl.pallas_call(
        kernel,
        out_shape=jax.ShapeDtypeStruct((batch_size, trg_vocab_size),
                                       out_dtype),
        grid=grid,
        in_specs=[
            # ids block indexed only by the batch grid coordinate: stays
            # resident in VMEM across the (innermost) vocab axis.
            pl.BlockSpec((tile_b, 1), lambda i, j: (i, 0)),
        ],
        out_specs=pl.BlockSpec((tile_b, tile_v), lambda i, j: (i, j)),
        compiler_params=pltpu.CompilerParams(
            dimension_semantics=("parallel", "parallel")),
    )(ids)


def _reference(ids, smoothing_value, pad_id, trg_vocab_size):
    # pure-JAX reference mirroring the PyTorch code
    b = ids.shape[0]
    confidence = 1.0 - smoothing_value
    base = smoothing_value / (trg_vocab_size - 2)
    out = jnp.full((b, trg_vocab_size), base, dtype=jnp.float32)
    col = jnp.arange(trg_vocab_size)[None, :]
    out = jnp.where(col == ids, confidence, out)
    out = out.at[:, pad_id].set(0.0)
    out = jnp.where(ids == pad_id, 0.0, out)
    return out


if __name__ == "__main__":
    pad_id = 0
    smoothing_value = 0.1

    # Case 1: small shapes, single tile per axis (default tile sizes clamp).
    key1 = jax.random.PRNGKey(0)
    b1, v1 = 8, 512
    ids1 = jax.random.randint(key1, (b1, 1), 0, v1, dtype=jnp.int32)
    ids1 = ids1.at[1, 0].set(pad_id)   # exercise the masked_fill_ (pad-row) path
    out1 = label_smoothing_distribution(
        ids1, smoothing_value=smoothing_value, pad_id=pad_id,
        trg_vocab_size=v1)
    out1 = jax.block_until_ready(out1)
    ref1 = _reference(ids1, smoothing_value, pad_id, v1)
    assert out1.shape == (b1, v1)
    assert out1.dtype == jnp.float32
    assert jnp.allclose(out1, ref1, atol=1e-6), "case 1 mismatch vs reference"

    # Case 2: non-divisible vocab + batch tiling (boundary blocks exercised).
    key2 = jax.random.PRNGKey(0)
    b2, v2 = 16, 1000
    ids2 = jax.random.randint(key2, (b2, 1), 0, v2, dtype=jnp.int32)
    ids2 = ids2.at[3, 0].set(pad_id)
    out2 = label_smoothing_distribution(
        ids2, smoothing_value=smoothing_value, pad_id=pad_id,
        trg_vocab_size=v2, tile_b=8, tile_v=128)
    out2 = jax.block_until_ready(out2)
    ref2 = _reference(ids2, smoothing_value, pad_id, v2)
    assert out2.shape == (b2, v2)
    assert jnp.allclose(out2, ref2, atol=1e-6), "case 2 mismatch vs reference"

    print("KERNEL_OK")
</pallas_src>

<mosaic_0001>
module attributes {stable_mosaic.version = 11 : i64} {
  func.func @_label_smoothing_kernel(%arg0: i32, %arg1: i32, %arg2: memref<8x1xi32, #tpu.memory_space<vmem>>, %arg3: memref<8x512xf32, #tpu.memory_space<vmem>>) attributes {dimension_semantics = [#tpu.dimension_semantics<parallel>, #tpu.dimension_semantics<parallel>], iteration_bounds = array<i64: 1, 1>, scalar_prefetch = 0 : i64, scratch_operands = 0 : i64, tpu.core_type = #tpu.core_type<tc>, window_params = [{transform_indices = @transform_0, window_bounds = array<i64: 8, 1>}, {transform_indices = @transform_1, window_bounds = array<i64: 8, 512>}]} {
    %c512_i32 = arith.constant 512 : i32
    %0 = arith.muli %arg1, %c512_i32 : i32
    %c0 = arith.constant 0 : index
    %c0_0 = arith.constant 0 : index
    %1 = vector.load %arg2[%c0, %c0_0] : memref<8x1xi32, #tpu.memory_space<vmem>>, vector<8x1xi32>
    %2 = tpu.iota {dimensions = array<i32: 1>} : vector<8x512xi32>
    %3 = vector.broadcast %0 : i32 to vector<8x512xi32>
    %4 = arith.addi %2, %3 : vector<8x512xi32>
    %5 = vector.broadcast %1 : vector<8x1xi32> to vector<8x512xi32>
    %6 = arith.cmpi eq, %4, %5 : vector<8x512xi32>
    %cst = arith.constant 0.899999976 : f32
    %cst_1 = arith.constant 1.96078428E-4 : f32
    %7 = vector.broadcast %cst : f32 to vector<8x512xf32>
    %8 = vector.broadcast %cst_1 : f32 to vector<8x512xf32>
    %9 = arith.select %6, %7, %8 : vector<8x512xi1>, vector<8x512xf32>
    %c0_i32 = arith.constant 0 : i32
    %10 = vector.broadcast %c0_i32 : i32 to vector<8x512xi32>
    %11 = arith.cmpi eq, %4, %10 : vector<8x512xi32>
    %c0_i32_2 = arith.constant 0 : i32
    %12 = vector.broadcast %c0_i32_2 : i32 to vector<8x1xi32>
    %13 = arith.cmpi eq, %1, %12 : vector<8x1xi32>
    %14 = vector.broadcast %13 : vector<8x1xi1> to vector<8x512xi1>
    %15 = arith.ori %11, %14 : vector<8x512xi1>
    %cst_3 = arith.constant 0.000000e+00 : f32
    %16 = vector.broadcast %cst_3 : f32 to vector<8x512xf32>
    %17 = arith.select %15, %16, %9 : vector<8x512xi1>, vector<8x512xf32>
    %c0_4 = arith.constant 0 : index
    %c0_5 = arith.constant 0 : index
    %18 = vector.load %arg3[%c0_4, %c0_5] : memref<8x512xf32, #tpu.memory_space<vmem>>, vector<8x512xf32>
    tpu.vector_store %arg3[%c0_4, %c0_5], %17 {strides = array<i32>} : memref<8x512xf32, #tpu.memory_space<vmem>>, vector<8x512xf32>,
    return
  }
  func.func @transform_0(%arg0: i32, %arg1: i32) -> (i32, i32) {
    %c0_i32 = arith.constant 0 : i32
    %c0_i32_0 = arith.constant 0 : i32
    return %arg0, %c0_i32 : i32, i32
  }
  func.func @transform_1(%arg0: i32, %arg1: i32) -> (i32, i32) {
    %c0_i32 = arith.constant 0 : i32
    return %arg0, %arg1 : i32, i32
  }
}

</mosaic_0001>

<bundles_post_ra>
// kernel: tpu_custom_call.1
= control target key start
LH: loop header
LB: loop body
LE: loop exit
PB: predicated region body
PF: predicated region fallthrough
CT: control target
= control target key end

     0   :  { %s124_s0 = inlined_call_operand.vmem [shape: s32[8,1], index: 0, kind: input, shape index: {}]   ;;  %s125_s1 = inlined_call_operand.hbm [shape: f32[8,512], index: 1, kind: output, shape index: {}]  }
   0x1   :  { %v10_v0 = vld [vmem:[%s124_s0] sm:$0xff] }
   0x2   :  { %6 = vsyncpa [#allocation3], 0  ;;  %v96_v1 = vmov 0   ;;  %vm36_vm0 = vcmp.eq.s32.totalorder %v10_v0, 0  ;;  %v11_v3 = vlaneseq  ;;  %s97_s8 = smov [#allocation2]  }
   0x3   :  { %71 = vset.pattern.permute.xlu0 %v96_v1  ;;  %v37_v2 = vsel %vm36_vm0, 1, %v96_v1  ;;  %s60_s0 = sshll.u32 %s97_s8, 4  ;;  %v98_v9 = vmov 0.00019607843   ;;  %s61_s0 = int_to_ptr.vmem [resolvable:$true] %s60_s0 }
   0x4   :  { %22 = vperm.xlu0 %71, %v10_v0   ;;  %v12_v4 = vand.u32 127, %v11_v3  ;;  %s72_s9 = scalar_lea.vmem %s61_s0, 512  ;;  %p77_p1 = scmp.lt.s32.totalorder %s61_s0, %s61_s0 }
   0x5   :  { %p73_p0 = scmp.ne.s32.totalorder %s61_s0, %s72_s9  ;;  %p78_p2 = scmp.lt.s32.totalorder %s72_s9, %s72_s9 }
   0x6   :  { %v13_v5 = vadd.s32 128, %v12_v4  ;;  %v14_v6 = vadd.s32 256, %v12_v4  ;;  %v15_v7 = vadd.s32 384, %v12_v4  ;;  %vm32_vm5 = vcmp.eq.s32.totalorder %v12_v4, 0 }
   0x7   :  { %p79_p3 = por %p78_p2, %p77_p1 }
   0x8   :  { %39 = vperm.xlu0 %71, %v37_v2  }
   0x9   :  { %p80_p4 = pnand %p79_p3, %p73_p0 }
  0x83   :  { %v23_v8 = vpop.permute.xlu0 %22 }
  0x84   :  { %vm25_vm1 = vcmp.eq.s32.totalorder %v13_v5, %v23_v8  ;;  %vm26_vm2 = vcmp.eq.s32.totalorder %v14_v6, %v23_v8  ;;  %vm27_vm3 = vcmp.eq.s32.totalorder %v15_v7, %v23_v8  ;;  %vm24_vm4 = vcmp.eq.s32.totalorder %v12_v4, %v23_v8 }
  0x85   :  { %v29_v10 = vsel %vm25_vm1, 0.9, %v98_v9  ;;  %v30_v12 = vsel %vm26_vm2, 0.9, %v98_v9  ;;  %v31_v13 = vsel %vm27_vm3, 0.9, %v98_v9 }
  0x86   :  { %v28_v14 = vsel %vm24_vm4, 0.9, %v98_v9 }
  0x87   :  { %v40_v11 = vpop.permute.xlu0 %39 }
  0x88   :  { %vm41_vm6 = vcmp.eq.s32.totalorder %v40_v11, 1 }
  0x89   :  { %vm42_vm7 = vmor %vm32_vm5, %vm41_vm6  ;;  %v47_v15 = vsel %vm41_vm6, 0.0, %v29_v10  ;;  %v48_v16 = vsel %vm41_vm6, 0.0, %v30_v12  ;;  %v49_v17 = vsel %vm41_vm6, 0.0, %v31_v13 }
  0x8a   :  { %v46_v18 = vsel %vm42_vm7, 0.0, %v28_v14  ;;  %51 = vst [vmem:[#allocation2 + $0x8] sm:$0xff] %v47_v15  ;;  %52 = vst [vmem:[#allocation2 + $0x10] sm:$0xff] %v48_v16 }
  0x8b   :  { %53 = vst [vmem:[#allocation2 + $0x18] sm:$0xff] %v49_v17  ;;  %50 = vst [vmem:[#allocation2] sm:$0xff] %v46_v18 }
  0x8c   :  { %83 = shalt.err (!%p80_p4)
}
  0x8d   :  { %s84_s12 = scalar_lea.hbm %s125_s1, 512 }
  0x8e   :  { %p85_p5 = scmp.ne.s32.totalorder %s125_s1, %s84_s12  ;;  %p88_p6 = scmp.lt.u32.totalorder %s84_s12, %s125_s1 }
  0x90   :  { %p90_p7 = pnand %p88_p6, %p85_p5 }
  0x92   :  { %93 = shalt.err (!%p90_p7)
}
  0x93   :  { %63 = dma.vmem_to_hbm [thread:$0]  %s61_s0, 512, %s125_s1, [#allocation3]  }
  0x94   :  { %94 = dma.done.wait [#allocation3], 512  }
  0x95   :  { %95 = vsyncadd [#allocation3], 4294966784 }
  0x96   :  { %67 = vsyncpa [#allocation3], 1 }

</bundles_post_ra>
